<compile_context>
chip_gen: v5e
topology: v5e:2x2
jax: 0.10.0
libtpu: 0.0.40
codegen_flags: <defaults>
</compile_context>

<pallas_src>
import numpy as np
import jax
import jax.numpy as jnp
from jax.experimental import pallas as pl
from jax.experimental.pallas import tpu as pltpu


# ---------------------------------------------------------------------------
# Pallas kernel: hashed n-gram embedding lookup + mean (transposed layout)
# ---------------------------------------------------------------------------
def ngram_embed_kernel(idx_ref, cnt_ref, emb_hbm_ref, out_ref,
                       emb_vmem, iota_vmem, copy_sem):
    """out.T tile = (emb.T @ multiplicity.T) * reciprocal(count).

    idx_ref    : (K, TT)  int32   hashed n-gram ids per token (pad id 0 -> zero row)
    cnt_ref    : (1, TT)  float32 true n-gram count per token
    emb_hbm_ref: (D, V)   bf16    full transposed embedding table, left in HBM
    out_ref    : (D, TT)  bf16    transposed output tile (lane dim = TT -> dense vst)
    emb_vmem   : (D, V)   bf16    single-buffered VMEM copy of the table (scratch)
    iota_vmem  : (V, TT)  int32   persistent vocab-row-id grid, filled once per core chunk
    """
    K, TT = idx_ref.shape
    D, V = emb_vmem.shape

    # First inner step of each core's chunk: start the one-time table DMA and fill the
    # persistent iota scratch.  The DMA wait is deferred until just before the matmul so
    # the HBM->VMEM table copy hides behind the VPU compare/accumulate loop below.
    @pl.when(pl.program_id(1) == 0)
    def _():
        pltpu.make_async_copy(emb_hbm_ref, emb_vmem, copy_sem).start()
        iota_vmem[...] = jax.lax.broadcasted_iota(jnp.int32, (V, TT), 0)

    idx = idx_ref[...]            # (K, TT) int32
    vocab_ids = iota_vmem[...]    # (V, TT) int32 (hoisted; vld instead of per-step iota)

    # Multiplicity of each vocab row among each token's n-grams.  K is a small
    # compile-time constant -> unrolled static loop; accumulate in int32 and start
    # from the k=0 compare (no zero-init, no per-k f32 converts).
    w = (idx[0:1, :] == vocab_ids).astype(jnp.int32)
    for k in range(1, K):
        w = w + (idx[k:k + 1, :] == vocab_ids).astype(jnp.int32)

    # Table must be resident before the MXU reads it (only actually waits at t == 0).
    @pl.when(pl.program_id(1) == 0)
    def _():
        pltpu.make_async_copy(emb_hbm_ref, emb_vmem, copy_sem).wait()

    # bf16 MXU matmul with f32 accumulation: (D, V) @ (V, TT) -> (D, TT).
    acc = jnp.dot(emb_vmem[...], w.astype(jnp.bfloat16),
                  preferred_element_type=jnp.float32)

    # mean over n-grams: one cheap EUP (approx) reciprocal per token AFTER the matmul
    # (padded n-gram slots hit zero row 0, so this equals embedding(n_grams).mean(0)).
    out_ref[...] = (acc * pl.reciprocal(cnt_ref[...], approx=True)).astype(out_ref.dtype)


def _round_up(x, m):
    return ((x + m - 1) // m) * m


def _chip_params():
    """(n_core, vmem_limit_bytes) chosen per chip generation."""
    kind = jax.devices()[0].device_kind.lower()
    if "v7" in kind:                       # 2 TensorCores/chip, 64 MiB physical VMEM
        return 2, 48 * 1024 * 1024
    if "v5" in kind or "v6" in kind:       # 1 TensorCore/chip, 128 MiB physical VMEM
        return 1, 100 * 1024 * 1024
    return 1, 48 * 1024 * 1024             # conservative fallback (proven-safe limit)


def ngram_embedding_forward(ngram_idx, counts, emb_t, tile_t=1024):
    """ngram_idx (T, K) int32, counts (T,) f32, emb_t (D, V) bf16 -> (T, D) bf16.

    tile_t: token tile = lane dim of the transposed output.  Kept a 256-multiple
    (MXU-width friendly on v5e/v6e/v7x) and clamped to the per-core token count so tiny
    inputs are not padded up to a full tile.  Per-step VMEM budget:
      ~2*V*tile_t*4 (w int32 + iota scratch) + V*tile_t*2 (w bf16)
      + 2*tile_t*(4K + 2D + 4) (double-buffered idx/cnt/out blocks) + 2*V*D (bf16 table)
    which must stay under vmem_limit_bytes for the target chip.
    """
    T, K = ngram_idx.shape
    D, V = emb_t.shape
    assert K <= 256, "bf16 multiplicities are exact only for per-row counts <= 256"

    n_core, vmem_limit = _chip_params()
    tile_t = min(_round_up(tile_t, 256), _round_up(max(T // n_core, 1), 256))
    chunk = n_core * tile_t
    t_pad = _round_up(T, chunk)            # pad host-side instead of asserting
    steps = t_pad // chunk

    # Pack transposed so the token dim is the lane dim everywhere; pad rows use
    # n-gram id 0 (zero embedding row) and count 1 (also clamp real counts >= 1).
    idx_t = jnp.zeros((K, t_pad), jnp.int32).at[:, :T].set(jnp.asarray(ngram_idx).T)
    cnt_t = jnp.ones((1, t_pad), jnp.float32).at[0, :T].set(
        jnp.maximum(jnp.asarray(counts, jnp.float32), 1.0))

    out_t = pl.pallas_call(
        ngram_embed_kernel,
        out_shape=jax.ShapeDtypeStruct((D, t_pad), jnp.bfloat16),
        grid_spec=pltpu.PrefetchScalarGridSpec(
            num_scalar_prefetch=0,
            grid=(n_core, steps),          # outer "parallel" axis only >1 on v7x megacore
            in_specs=[
                pl.BlockSpec((K, tile_t), lambda c, t: (0, c * steps + t)),
                pl.BlockSpec((1, tile_t), lambda c, t: (0, c * steps + t)),
                pl.BlockSpec(memory_space=pl.ANY),     # table stays in HBM, manual DMA
            ],
            out_specs=pl.BlockSpec((D, tile_t), lambda c, t: (0, c * steps + t)),
            scratch_shapes=[
                pltpu.VMEM((D, V), jnp.bfloat16),      # single-buffered resident table
                pltpu.VMEM((V, tile_t), jnp.int32),    # hoisted vocab-id iota
                pltpu.SemaphoreType.DMA,
            ],
        ),
        compiler_params=pltpu.CompilerParams(
            dimension_semantics=("parallel", "arbitrary"),
            vmem_limit_bytes=vmem_limit,
        ),
    )(idx_t, cnt_t, emb_t)

    return out_t.T[:T]                     # (T, D) bf16


# ---------------------------------------------------------------------------
# Module ports (forward only)
# ---------------------------------------------------------------------------
class NGramEmbedding:
    """JAX/Pallas port of N_Gram_Embedding (forward only)."""

    def __init__(self, n_gram_size, emb_size, vocab, n=3, key=None):
        self.vocab = {v: k for k, v in vocab.items()}   # idx -> word
        self.emb_size = emb_size
        self.n = n
        self.n_grams = n_gram_size - 4
        w = jax.random.normal(key, (n_gram_size, emb_size), dtype=jnp.float32)
        self.embedding = w.at[0].set(0.0)               # padding_idx=0 stays exactly zero
        # Frozen weight: cache the transposed bf16 table once (used by every forward call).
        self.emb_t = self.embedding.T.astype(jnp.bfloat16)   # (D, V)

    # TODO(synk): python string hashing / vocab dict lookup has no TPU equivalent; stays host-side.
    def _hash(self, word):
        return hash(word) % self.n_grams + 4

    def _get_n_grams(self, word):
        n_grams = []
        for i in range(1, 1 + self.n):
            n_grams += [self._hash(word[j:j + i]) for j in range(len(word) - i + 1)]
        return n_grams

    def build_indices(self, word_idx):
        word_idx = np.asarray(word_idx)
        B, S = word_idx.shape
        per_tok = []
        for b in range(B):
            for s in range(S):
                wi = int(word_idx[b, s])
                if wi < 4:
                    per_tok.append([wi])                # direct lookup of special token
                else:
                    per_tok.append(self._get_n_grams(self.vocab[wi]))
        T = B * S
        K = max(len(t) for t in per_tok)
        idx = np.zeros((T, K), dtype=np.int32)          # pad with 0 -> zero embedding row
        cnt = np.zeros((T,), dtype=np.float32)
        for t, lst in enumerate(per_tok):
            idx[t, :len(lst)] = lst
            cnt[t] = max(len(lst), 1)                   # clamp: avoid reciprocal(0)
        return idx, cnt

    def forward(self, word_idx):
        B, S = np.asarray(word_idx).shape
        idx, cnt = self.build_indices(word_idx)
        out = ngram_embedding_forward(jnp.asarray(idx), jnp.asarray(cnt), self.emb_t)
        return out.reshape(B, S, self.emb_size).astype(jnp.float32)


class Encoder:
    """JAX port of Encoder (forward only): Pallas n-gram embedding + 1-layer bi-GRU."""

    def __init__(self, src_emb, hid_dim, n_gram_size, vocab, dropout=0.0, n_layers=1,
                 key=None):
        assert n_layers == 1                 # matches the spec default; dropout is a no-op
        self.hid_dim = hid_dim
        self.n_layers = n_layers
        k_emb, k_gru = jax.random.split(key)
        self.embedding = NGramEmbedding(n_gram_size, src_emb, vocab, n=3, key=k_emb)
        # PyTorch-layout GRU params per direction: W_ih (3H,E), W_hh (3H,H), b_* (3H,)
        ks = jax.random.split(k_gru, 8)
        s = 1.0 / np.sqrt(hid_dim)
        u = lambda k, shape: jax.random.uniform(k, shape, jnp.float32, -s, s)
        self.w_ih = [u(ks[0], (3 * hid_dim, src_emb)), u(ks[1], (3 * hid_dim, src_emb))]
        self.w_hh = [u(ks[2], (3 * hid_dim, hid_dim)), u(ks[3], (3 * hid_dim, hid_dim))]
        self.b_ih = [u(ks[4], (3 * hid_dim,)), u(ks[5], (3 * hid_dim,))]
        self.b_hh = [u(ks[6], (3 * hid_dim,)), u(ks[7], (3 * hid_dim,))]

    def init_hidden(self, batch_size):
        return jnp.zeros((self.n_layers * 2, batch_size, self.hid_dim), jnp.float32)

    # TODO(synk): the bidirectional GRU recurrence stays in plain JAX (lax.scan) — it is a
    # latency-bound sequential scan, not the Pallas hot path; the non-recurrent input
    # projections are batched into one matmul per direction before the scan.
    def _gru_direction(self, gx_all, lens, h0, w_hh, b_hh, reverse):
        B, S, _ = gx_all.shape
        H = self.hid_dim
        t_idx = jnp.arange(S, dtype=jnp.int32)
        if reverse:
            gx_seq = gx_all[:, ::-1, :]
            t_seq = t_idx[::-1]
        else:
            gx_seq = gx_all
            t_seq = t_idx
        gx_seq = jnp.transpose(gx_seq, (1, 0, 2))       # (S, B, 3H)

        def step(h, xs):
            gx, t = xs
            gh = h @ w_hh.T + b_hh
            r = jax.nn.sigmoid(gx[:, :H] + gh[:, :H])
            z = jax.nn.sigmoid(gx[:, H:2 * H] + gh[:, H:2 * H])
            n = jnp.tanh(gx[:, 2 * H:] + r * gh[:, 2 * H:])
            h_new = (1.0 - z) * n + z * h
            m = (t < lens)[:, None].astype(h.dtype)
            h_next = m * h_new + (1.0 - m) * h          # frozen past each sequence's length
            return h_next, m * h_new                    # padded positions -> 0 (pad_packed)

        h_last, outs = jax.lax.scan(step, h0, (gx_seq, t_seq))
        outs = jnp.transpose(outs, (1, 0, 2))           # (B, S, H)
        if reverse:
            outs = outs[:, ::-1, :]
        return outs, h_last

    def forward(self, x, h, seq_len):
        emb = self.embedding.forward(x)                 # (B, S, E) via Pallas kernel
        lens = jnp.asarray(seq_len, jnp.int32)
        # Batched non-recurrent input projections: one big matmul per direction instead of
        # S tiny per-timestep matmuls.
        gx_f = jnp.einsum('bse,ge->bsg', emb, self.w_ih[0]) + self.b_ih[0]
        gx_b = jnp.einsum('bse,ge->bsg', emb, self.w_ih[1]) + self.b_ih[1]
        out_f, h_f = self._gru_direction(gx_f, lens, h[0], self.w_hh[0], self.b_hh[0],
                                         reverse=False)
        out_b, h_b = self._gru_direction(gx_b, lens, h[1], self.w_hh[1], self.b_hh[1],
                                         reverse=True)
        output = jnp.concatenate([out_f, out_b], axis=-1)   # (B, S, 2H)
        h_n = jnp.stack([h_f, h_b], axis=0)                 # (2, B, H)
        return output, h_n


if __name__ == "__main__":
    key = jax.random.PRNGKey(0)
    k_model, k_idx = jax.random.split(key)

    vocab_words = ["the", "cat", "sat", "on", "mat", "dog",
                   "ran", "fast", "jumps", "over", "lazy", "fox"]
    vocab = {w: i + 4 for i, w in enumerate(vocab_words)}   # {word: idx}, idx >= 4

    n_gram_size = 68      # 64 hashed n-gram buckets + 4 special tokens
    emb_size = 32
    hid_dim = 32
    model = Encoder(emb_size, hid_dim, n_gram_size, vocab, dropout=0.0, n_layers=1,
                    key=k_model)

    B, S = 2, 8
    word_idx = np.asarray(
        jax.random.randint(k_idx, (B, S), 0, 4 + len(vocab_words)), dtype=np.int32)
    seq_len = [8, 6]                      # sorted descending, max == S
    h0 = model.init_hidden(B)

    # --- run the Pallas embedding kernel and check against a numpy reference ---
    emb_out = jax.block_until_ready(model.embedding.forward(word_idx))
    idx_np, cnt_np = model.embedding.build_indices(word_idx)
    # reference uses the same bf16-rounded table the kernel uses; f32 accumulation,
    # approx reciprocal and the bf16 output store leave ~0.5% relative error, so the
    # tolerance is relaxed vs f32-exact (intentional, documented).
    emb_bf = np.asarray(model.embedding.embedding.astype(jnp.bfloat16).astype(jnp.float32))
    ref = (emb_bf[idx_np].sum(axis=1) / cnt_np[:, None]).reshape(B, S, emb_size)
    assert emb_out.shape == (B, S, emb_size)
    assert np.allclose(np.asarray(emb_out), ref, atol=1e-2, rtol=1e-2)

    # --- full Encoder forward (Pallas embedding + scanned bi-GRU) ---
    output, h_n = model.forward(word_idx, h0, seq_len)
    output = jax.block_until_ready(output)
    h_n = jax.block_until_ready(h_n)
    assert output.shape == (B, S, 2 * hid_dim)
    assert h_n.shape == (2, B, hid_dim)
    assert bool(jnp.all(jnp.isfinite(output))) and bool(jnp.all(jnp.isfinite(h_n)))

    print("KERNEL_OK")
</pallas_src>

<mosaic_0001>
module attributes {stable_mosaic.version = 11 : i64} {
  func.func @ngram_embed_kernel(%arg0: i32, %arg1: i32, %arg2: memref<9x256xi32, #tpu.memory_space<vmem>>, %arg3: memref<1x256xf32, #tpu.memory_space<vmem>>, %arg4: memref<32x68xbf16, #tpu.memory_space<any>>, %arg5: memref<32x256xbf16, #tpu.memory_space<vmem>>, %arg6: memref<32x68xbf16, #tpu.memory_space<vmem>>, %arg7: memref<68x256xi32, #tpu.memory_space<vmem>>, %arg8: memref<!tpu.dma_semaphore, #tpu.memory_space<semaphore_mem>>) attributes {dimension_semantics = [#tpu.dimension_semantics<parallel>, #tpu.dimension_semantics<arbitrary>], iteration_bounds = array<i64: 1, 1>, scalar_prefetch = 0 : i64, scratch_operands = 3 : i64, tpu.core_type = #tpu.core_type<tc>, window_params = [{transform_indices = @transform_0, window_bounds = array<i64: 9, 256>}, {transform_indices = @transform_1, window_bounds = array<i64: 1, 256>}, {}, {transform_indices = @transform_3, window_bounds = array<i64: 32, 256>}]} {
    %c0_i32 = arith.constant 0 : i32
    %0 = arith.cmpi eq, %arg1, %c0_i32 : i32
    %1 = arith.extui %0 : i1 to i32
    %c0_i32_0 = arith.constant 0 : i32
    %2 = arith.cmpi ne, %1, %c0_i32_0 : i32
    scf.if %2 {
      tpu.enqueue_dma source(%arg4 : memref<32x68xbf16, #tpu.memory_space<any>>) target(%arg6 : memref<32x68xbf16, #tpu.memory_space<vmem>>) target_semaphore(%arg8 : memref<!tpu.dma_semaphore, #tpu.memory_space<semaphore_mem>>)
      %61 = tpu.iota {dimensions = array<i32: 0>} : vector<68x256xi32>
      %c0_12 = arith.constant 0 : index
      %c0_13 = arith.constant 0 : index
      %62 = vector.load %arg7[%c0_12, %c0_13] : memref<68x256xi32, #tpu.memory_space<vmem>>, vector<68x256xi32>
      tpu.vector_store %arg7[%c0_12, %c0_13], %61 {strides = array<i32>} : memref<68x256xi32, #tpu.memory_space<vmem>>, vector<68x256xi32>,
    } else {
    }
    %c0 = arith.constant 0 : index
    %c0_1 = arith.constant 0 : index
    %3 = vector.load %arg2[%c0, %c0_1] : memref<9x256xi32, #tpu.memory_space<vmem>>, vector<9x256xi32>
    %c0_2 = arith.constant 0 : index
    %c0_3 = arith.constant 0 : index
    %4 = vector.load %arg7[%c0_2, %c0_3] : memref<68x256xi32, #tpu.memory_space<vmem>>, vector<68x256xi32>
    %5 = vector.extract_strided_slice %3 {offsets = [0, 0], sizes = [1, 256], strides = [1, 1]} : vector<9x256xi32> to vector<1x256xi32>
    %6 = vector.broadcast %5 : vector<1x256xi32> to vector<68x256xi32>
    %7 = arith.cmpi eq, %6, %4 : vector<68x256xi32>
    %8 = arith.extui %7 : vector<68x256xi1> to vector<68x256xi32>
    %9 = vector.extract_strided_slice %3 {offsets = [1, 0], sizes = [1, 256], strides = [1, 1]} : vector<9x256xi32> to vector<1x256xi32>
    %10 = vector.broadcast %9 : vector<1x256xi32> to vector<68x256xi32>
    %11 = arith.cmpi eq, %10, %4 : vector<68x256xi32>
    %12 = arith.extui %11 : vector<68x256xi1> to vector<68x256xi32>
    %13 = arith.addi %8, %12 : vector<68x256xi32>
    %14 = vector.extract_strided_slice %3 {offsets = [2, 0], sizes = [1, 256], strides = [1, 1]} : vector<9x256xi32> to vector<1x256xi32>
    %15 = vector.broadcast %14 : vector<1x256xi32> to vector<68x256xi32>
    %16 = arith.cmpi eq, %15, %4 : vector<68x256xi32>
    %17 = arith.extui %16 : vector<68x256xi1> to vector<68x256xi32>
    %18 = arith.addi %13, %17 : vector<68x256xi32>
    %19 = vector.extract_strided_slice %3 {offsets = [3, 0], sizes = [1, 256], strides = [1, 1]} : vector<9x256xi32> to vector<1x256xi32>
    %20 = vector.broadcast %19 : vector<1x256xi32> to vector<68x256xi32>
    %21 = arith.cmpi eq, %20, %4 : vector<68x256xi32>
    %22 = arith.extui %21 : vector<68x256xi1> to vector<68x256xi32>
    %23 = arith.addi %18, %22 : vector<68x256xi32>
    %24 = vector.extract_strided_slice %3 {offsets = [4, 0], sizes = [1, 256], strides = [1, 1]} : vector<9x256xi32> to vector<1x256xi32>
    %25 = vector.broadcast %24 : vector<1x256xi32> to vector<68x256xi32>
    %26 = arith.cmpi eq, %25, %4 : vector<68x256xi32>
    %27 = arith.extui %26 : vector<68x256xi1> to vector<68x256xi32>
    %28 = arith.addi %23, %27 : vector<68x256xi32>
    %29 = vector.extract_strided_slice %3 {offsets = [5, 0], sizes = [1, 256], strides = [1, 1]} : vector<9x256xi32> to vector<1x256xi32>
    %30 = vector.broadcast %29 : vector<1x256xi32> to vector<68x256xi32>
    %31 = arith.cmpi eq, %30, %4 : vector<68x256xi32>
    %32 = arith.extui %31 : vector<68x256xi1> to vector<68x256xi32>
    %33 = arith.addi %28, %32 : vector<68x256xi32>
    %34 = vector.extract_strided_slice %3 {offsets = [6, 0], sizes = [1, 256], strides = [1, 1]} : vector<9x256xi32> to vector<1x256xi32>
    %35 = vector.broadcast %34 : vector<1x256xi32> to vector<68x256xi32>
    %36 = arith.cmpi eq, %35, %4 : vector<68x256xi32>
    %37 = arith.extui %36 : vector<68x256xi1> to vector<68x256xi32>
    %38 = arith.addi %33, %37 : vector<68x256xi32>
    %39 = vector.extract_strided_slice %3 {offsets = [7, 0], sizes = [1, 256], strides = [1, 1]} : vector<9x256xi32> to vector<1x256xi32>
    %40 = vector.broadcast %39 : vector<1x256xi32> to vector<68x256xi32>
    %41 = arith.cmpi eq, %40, %4 : vector<68x256xi32>
    %42 = arith.extui %41 : vector<68x256xi1> to vector<68x256xi32>
    %43 = arith.addi %38, %42 : vector<68x256xi32>
    %44 = vector.extract_strided_slice %3 {offsets = [8, 0], sizes = [1, 256], strides = [1, 1]} : vector<9x256xi32> to vector<1x256xi32>
    %45 = vector.broadcast %44 : vector<1x256xi32> to vector<68x256xi32>
    %46 = arith.cmpi eq, %45, %4 : vector<68x256xi32>
    %47 = arith.extui %46 : vector<68x256xi1> to vector<68x256xi32>
    %48 = arith.addi %43, %47 : vector<68x256xi32>
    %c0_i32_4 = arith.constant 0 : i32
    %49 = arith.cmpi eq, %arg1, %c0_i32_4 : i32
    %50 = arith.extui %49 : i1 to i32
    %c0_i32_5 = arith.constant 0 : i32
    %51 = arith.cmpi ne, %50, %c0_i32_5 : i32
    scf.if %51 {
      tpu.wait_dma2 semaphore(%arg8 : memref<!tpu.dma_semaphore, #tpu.memory_space<semaphore_mem>>) src(%arg4 : memref<32x68xbf16, #tpu.memory_space<any>>) dst(%arg6 : memref<32x68xbf16, #tpu.memory_space<vmem>>)
    } else {
    }
    %c0_6 = arith.constant 0 : index
    %c0_7 = arith.constant 0 : index
    %52 = vector.load %arg6[%c0_6, %c0_7] : memref<32x68xbf16, #tpu.memory_space<vmem>>, vector<32x68xbf16>
    %53 = arith.sitofp %48 : vector<68x256xi32> to vector<68x256xbf16>
    %cst = arith.constant dense<0.000000e+00> : vector<32x256xf32>
    %54 = tpu.matmul %52, %53, %cst {dimension_numbers = #tpu.dot_dimension_numbers<[1], [0], [0], [1], [0, 0, 1, 1], [], []>} : vector<32x68xbf16>, vector<68x256xbf16>, vector<32x256xf32> -> vector<32x256xf32>
    %c0_8 = arith.constant 0 : index
    %c0_9 = arith.constant 0 : index
    %55 = vector.load %arg3[%c0_8, %c0_9] : memref<1x256xf32, #tpu.memory_space<vmem>>, vector<1x256xf32>
    %56 = tpu.reciprocal %55 {approx = true} : vector<1x256xf32> -> vector<1x256xf32>
    %57 = vector.broadcast %56 : vector<1x256xf32> to vector<32x256xf32>
    %58 = arith.mulf %54, %57 : vector<32x256xf32>
    %59 = arith.truncf %58 : vector<32x256xf32> to vector<32x256xbf16>
    %c0_10 = arith.constant 0 : index
    %c0_11 = arith.constant 0 : index
    %60 = vector.load %arg5[%c0_10, %c0_11] : memref<32x256xbf16, #tpu.memory_space<vmem>>, vector<32x256xbf16>
    tpu.vector_store %arg5[%c0_10, %c0_11], %59 {strides = array<i32>} : memref<32x256xbf16, #tpu.memory_space<vmem>>, vector<32x256xbf16>,
    return
  }
  func.func @transform_0(%arg0: i32, %arg1: i32) -> (i32, i32) {
    %c1_i32 = arith.constant 1 : i32
    %0 = arith.muli %arg0, %c1_i32 : i32
    %1 = arith.addi %0, %arg1 : i32
    %c0_i32 = arith.constant 0 : i32
    %c0_i32_0 = arith.constant 0 : i32
    return %c0_i32, %1 : i32, i32
  }
  func.func @transform_1(%arg0: i32, %arg1: i32) -> (i32, i32) {
    %c1_i32 = arith.constant 1 : i32
    %0 = arith.muli %arg0, %c1_i32 : i32
    %1 = arith.addi %0, %arg1 : i32
    %c0_i32 = arith.constant 0 : i32
    %c0_i32_0 = arith.constant 0 : i32
    return %c0_i32, %1 : i32, i32
  }
  func.func @transform_3(%arg0: i32, %arg1: i32) -> (i32, i32) {
    %c1_i32 = arith.constant 1 : i32
    %0 = arith.muli %arg0, %c1_i32 : i32
    %1 = arith.addi %0, %arg1 : i32
    %c0_i32 = arith.constant 0 : i32
    %c0_i32_0 = arith.constant 0 : i32
    return %c0_i32, %1 : i32, i32
  }
}

</mosaic_0001>

<bundles_post_ra>
// kernel: tpu_custom_call.1
= control target key start
LH: loop header
LB: loop body
LE: loop exit
PB: predicated region body
PF: predicated region fallthrough
CT: control target
= control target key end

     0   :  { %8 = vsyncpa [#allocation6], 0  ;;  %s1619_s0 = inlined_call_operand.hbm [shape: s32[9,256], index: 0, kind: input, shape index: {}]   ;;  %s1620_s1 = inlined_call_operand.hbm [shape: f32[1,256], index: 1, kind: input, shape index: {}]   ;;  %s1621_s2 = inlined_call_operand.hbm [shape: bf16[32,68], index: 2, kind: input, shape index: {}]   ;;  %s1622_s3 = inlined_call_operand.hbm [shape: bf16[32,256], index: 3, kind: output, shape index: {}]  }
   0x1   :  { %9 = vsyncpa [#allocation9], 0 }
   0x2   :  { %10 = vsyncpa [#allocation7], 0  ;;  %s19_s14 = sshll.u32 %s1619_s0, 4  ;;  %s906_s15 = smov [#allocation5]   ;;  %s20_s14 = int_to_ptr.hbm [resolvable:$true] %s19_s14 }
   0x3   :  { %s21_s16 = sshll.u32 %s906_s15, 4  ;;  %s36_s19 = sshll.u32 %s1620_s1, 4  ;;  %s22_s16 = int_to_ptr.vmem [resolvable:$true] %s21_s16  ;;  %s37_s19 = int_to_ptr.hbm [resolvable:$true] %s36_s19 }
   0x4   :  { %s907_s20 = smov 256   ;;  %s908_s21 = smov 16  }
   0x5   :  { %27 = dma.hbm_to_vmem [thread:$0]  %s20_s14, 512, %s22_s16, [#allocation6], %s907_s20, %s907_s20, %s908_s21  }
   0x6   :  { %s909_s22 = smov [#allocation8]  }
   0x7   :  { %s38_s23 = sshll.u32 %s909_s22, 4  ;;  %s39_s23 = int_to_ptr.vmem [resolvable:$true] %s38_s23 }
   0x8   :  { %41 = dma.hbm_to_vmem [thread:$0]  %s37_s19, 32, %s39_s23, [#allocation9]  }
   0x9   :  { %898 = dma.done.wait [#allocation6], 512  }
   0xa   :  { %899 = vsyncadd [#allocation6], 4294966784 }
   0xb   :  { %900 = dma.done.wait [#allocation9], 32  }
   0xc   :  { %901 = vsyncadd [#allocation9], 4294967264  ;;  %v74_v0 = vlaneseq  ;;  %v102_v4 = vld [vmem:[#allocation5] sm:$0xff]  ;;  %v910_v11 = vmov 0   ;;  %v103_v16 = vld [vmem:[#allocation5 + $0x8] sm:$0xff]  ;;  %s68_s24 = sshll.u32 %s1621_s2, 4  ;;  %s69_s24 = int_to_ptr.hbm [resolvable:$true] %s68_s24 }
   0xd   :  { %v949_v5 = vperm.slane %v102_v4, 0  ;;  %v951_v6 = vperm.slane %v102_v4, 1  ;;  %v953_v7 = vperm.slane %v102_v4, 2  ;;  %v955_v8 = vperm.slane %v102_v4, 3  ;;  %v984_v21 = vld [vmem:[#allocation5 + $0x10] ss:$0 sm:$0xff] }
   0xe   :  { %v941_v1 = vshrl.u32 %v74_v0, 7  ;;  %v957_v9 = vperm.slane %v102_v4, 4  ;;  %v959_v10 = vperm.slane %v102_v4, 5  ;;  %v972_v15 = vperm.slane %v102_v4, 6  ;;  %s911_s25 = smov [#allocation2]  }
   0xf   :  { %v978_v18 = vperm.slane %v102_v4, 7  ;;  %v989_v24 = vperm.slane %v103_v16, 0  ;;  %v993_v25 = vperm.slane %v103_v16, 1  ;;  %v995_v26 = vperm.slane %v103_v16, 2  ;;  %s70_s26 = sshll.u32 %s911_s25, 4  ;;  %s71_s26 = int_to_ptr.vmem [resolvable:$true] %s70_s26 }
  0x10   :  { %v944_v2 = vadd.s32 8, %v941_v1  ;;  %v947_v3 = vadd.s32 16, %v941_v1  ;;  %vm126_vm0 = vcmp.eq.s32.totalorder %v949_v5, %v941_v1  ;;  %vm164_vm1 = vcmp.eq.s32.totalorder %v951_v6, %v941_v1  ;;  %v1029_v38 = vld [vmem:[#allocation5 + $0x18] ss:$0 sm:$0xff]  ;;  %73 = dma.hbm_to_vmem [thread:$0]  %s69_s24, 256, %s71_s26, [#allocation4] }
  0x11   :  { %vm220_vm2 = vcmp.eq.s32.totalorder %v953_v7, %v941_v1  ;;  %vm276_vm3 = vcmp.eq.s32.totalorder %v955_v8, %v941_v1  ;;  %v144_v12 = vsel %vm126_vm0, 1, %v910_v11  ;;  %v182_v13 = vsel %vm164_vm1, 1, %v910_v11 }
  0x12   :  { %v238_v14 = vsel %vm220_vm2, 1, %v910_v11  ;;  %v200_v17 = vadd.s32 %v182_v13, %v144_v12  ;;  %vm332_vm4 = vcmp.eq.s32.totalorder %v957_v9, %v941_v1  ;;  %vm388_vm5 = vcmp.eq.s32.totalorder %v959_v10, %v941_v1 }
  0x13   :  { %v294_v19 = vsel %vm276_vm3, 1, %v910_v11  ;;  %v350_v20 = vsel %vm332_vm4, 1, %v910_v11  ;;  %vm444_vm6 = vcmp.eq.s32.totalorder %v972_v15, %v941_v1  ;;  %v406_v23 = vsel %vm388_vm5, 1, %v910_v11 }
  0x14   :  { %v256_v22 = vadd.s32 %v238_v14, %v200_v17  ;;  %vm500_vm7 = vcmp.eq.s32.totalorder %v978_v18, %v941_v1  ;;  %vm556_vm8 = vcmp.eq.s32.totalorder %v984_v21, %v941_v1  ;;  %v997_v27 = vperm.slane %v103_v16, 3 }
  0x15   :  { %vm127_vm9 = vcmp.eq.s32.totalorder %v989_v24, %v941_v1  ;;  %v1001_v29 = vperm.slane %v103_v16, 4  ;;  %v1003_v30 = vperm.slane %v103_v16, 5  ;;  %vm165_vm10 = vcmp.eq.s32.totalorder %v993_v25, %v941_v1 }
  0x16   :  { %v312_v28 = vadd.s32 %v294_v19, %v256_v22  ;;  %v145_v31 = vsel %vm127_vm9, 1, %v910_v11  ;;  %vm221_vm11 = vcmp.eq.s32.totalorder %v995_v26, %v941_v1  ;;  %vm277_vm12 = vcmp.eq.s32.totalorder %v997_v27, %v941_v1 }
  0x17   :  { %v462_v33 = vsel %vm444_vm6, 1, %v910_v11  ;;  %v183_v34 = vsel %vm165_vm10, 1, %v910_v11  ;;  %v239_v35 = vsel %vm221_vm11, 1, %v910_v11  ;;  %v518_v36 = vsel %vm500_vm7, 1, %v910_v11 }
  0x18   :  { %v368_v32 = vadd.s32 %v350_v20, %v312_v28  ;;  %v201_v37 = vadd.s32 %v183_v34, %v145_v31  ;;  %vm333_vm13 = vcmp.eq.s32.totalorder %v1001_v29, %v941_v1  ;;  %vm389_vm14 = vcmp.eq.s32.totalorder %v1003_v30, %v941_v1 }
  0x19   :  { %v574_v40 = vsel %vm556_vm8, 1, %v910_v11  ;;  %v295_v41 = vsel %vm277_vm12, 1, %v910_v11  ;;  %v1039_v42 = vperm.slane %v103_v16, 6  ;;  %v351_v44 = vsel %vm333_vm13, 1, %v910_v11 }
  0x1a   :  { %v424_v39 = vadd.s32 %v406_v23, %v368_v32  ;;  %v257_v43 = vadd.s32 %v239_v35, %v201_v37  ;;  %v1042_v45 = vperm.slane %v103_v16, 7  ;;  %vm128_vm15 = vcmp.eq.s32.totalorder %v949_v5, %v944_v2 }
  0x1b   :  { %v407_v47 = vsel %vm389_vm14, 1, %v910_v11  ;;  %vm445_vm0 = vcmp.eq.s32.totalorder %v1039_v42, %v941_v1  ;;  %vm557_vm1 = vcmp.eq.s32.totalorder %v1029_v38, %v941_v1  ;;  %v146_v49 = vsel %vm128_vm15, 1, %v910_v11 }
  0x1c   :  { %v480_v46 = vadd.s32 %v462_v33, %v424_v39  ;;  %v313_v48 = vadd.s32 %v295_v41, %v257_v43  ;;  %vm501_vm2 = vcmp.eq.s32.totalorder %v1042_v45, %v941_v1  ;;  %vm166_vm3 = vcmp.eq.s32.totalorder %v951_v6, %v944_v2 }
  0x1d   :  { %v184_v51 = vsel %vm166_vm3, 1, %v910_v11  ;;  %vm222_vm4 = vcmp.eq.s32.totalorder %v953_v7, %v944_v2  ;;  %vm278_vm5 = vcmp.eq.s32.totalorder %v955_v8, %v944_v2  ;;  %v463_v53 = vsel %vm445_vm0, 1, %v910_v11 }
  0x1e   :  { %v536_v50 = vadd.s32 %v518_v36, %v480_v46  ;;  %v369_v52 = vadd.s32 %v351_v44, %v313_v48  ;;  %v202_v54 = vadd.s32 %v184_v51, %v146_v49  ;;  %v240_v55 = vsel %vm222_vm4, 1, %v910_v11 }
  0x1f   :  { %v296_v57 = vsel %vm278_vm5, 1, %v910_v11  ;;  %vm334_vm6 = vcmp.eq.s32.totalorder %v957_v9, %v944_v2  ;;  %vm390_vm7 = vcmp.eq.s32.totalorder %v959_v10, %v944_v2  ;;  %v519_v59 = vsel %vm501_vm2, 1, %v910_v11 }
  0x20   :  { %v1063_v56 = vadd.s32 %v574_v40, %v536_v50  ;;  %v425_v58 = vadd.s32 %v407_v47, %v369_v52  ;;  %v575_v60 = vsel %vm557_vm1, 1, %v910_v11  ;;  %v258_v61 = vadd.s32 %v240_v55, %v202_v54 }
  0x21   :  { %v352_v62 = vsel %vm334_vm6, 1, %v910_v11  ;;  %v408_v63 = vsel %vm390_vm7, 1, %v910_v11  ;;  %vm446_vm8 = vcmp.eq.s32.totalorder %v972_v15, %v944_v2  ;;  %vm129_vm9 = vcmp.eq.s32.totalorder %v989_v24, %v944_v2 }
  0x22   :  { %v481_v0 = vadd.s32 %v463_v53, %v425_v58  ;;  %v314_v4 = vadd.s32 %v296_v57, %v258_v61  ;;  %vm502_vm10 = vcmp.eq.s32.totalorder %v978_v18, %v944_v2  ;;  %vm558_vm11 = vcmp.eq.s32.totalorder %v984_v21, %v944_v2 }
  0x23   :  { %v147_v12 = vsel %vm129_vm9, 1, %v910_v11  ;;  %vm167_vm12 = vcmp.eq.s32.totalorder %v993_v25, %v944_v2  ;;  %vm223_vm13 = vcmp.eq.s32.totalorder %v995_v26, %v944_v2  ;;  %vm279_vm14 = vcmp.eq.s32.totalorder %v997_v27, %v944_v2 }
  0x24   :  { %v537_v13 = vadd.s32 %v519_v59, %v481_v0  ;;  %v370_v14 = vadd.s32 %v352_v62, %v314_v4  ;;  %v185_v16 = vsel %vm167_vm12, 1, %v910_v11  ;;  %v241_v17 = vsel %vm223_vm13, 1, %v910_v11 }
  0x25   :  { %v464_v19 = vsel %vm446_vm8, 1, %v910_v11  ;;  %v203_v20 = vadd.s32 %v185_v16, %v147_v12  ;;  %vm335_vm15 = vcmp.eq.s32.totalorder %v1001_v29, %v944_v2  ;;  %vm391_vm0 = vcmp.eq.s32.totalorder %v1003_v30, %v944_v2 }
  0x26   :  { %v1102_v22 = vadd.s32 %v575_v60, %v537_v13  ;;  %v426_v23 = vadd.s32 %v408_v63, %v370_v14  ;;  %v520_v28 = vsel %vm502_vm10, 1, %v910_v11  ;;  %v297_v31 = vsel %vm279_vm14, 1, %v910_v11 }
  0x27   :  { %v576_v32 = vsel %vm558_vm11, 1, %v910_v11  ;;  %v259_v33 = vadd.s32 %v241_v17, %v203_v20  ;;  %v353_v34 = vsel %vm335_vm15, 1, %v910_v11  ;;  %v409_v35 = vsel %vm391_vm0, 1, %v910_v11 }
  0x28   :  { %v482_v36 = vadd.s32 %v464_v19, %v426_v23  ;;  %vm447_vm1 = vcmp.eq.s32.totalorder %v1039_v42, %v944_v2  ;;  %vm503_vm2 = vcmp.eq.s32.totalorder %v1042_v45, %v944_v2  ;;  %vm559_vm3 = vcmp.eq.s32.totalorder %v1029_v38, %v944_v2 }
  0x29   :  { %v315_v37 = vadd.s32 %v297_v31, %v259_v33  ;;  %vm130_vm4 = vcmp.eq.s32.totalorder %v949_v5, %v947_v3  ;;  %vm168_vm5 = vcmp.eq.s32.totalorder %v951_v6, %v947_v3  ;;  %vm224_vm6 = vcmp.eq.s32.totalorder %v953_v7, %v947_v3 }
  0x2a   :  { %v538_v39 = vadd.s32 %v520_v28, %v482_v36  ;;  %v148_v40 = vsel %vm130_vm4, 1, %v910_v11  ;;  %v186_v41 = vsel %vm168_vm5, 1, %v910_v11  ;;  %v242_v43 = vsel %vm224_vm6, 1, %v910_v11 }
  0x2b   :  { %v371_v44 = vadd.s32 %v353_v34, %v315_v37  ;;  %v204_v46 = vadd.s32 %v186_v41, %v148_v40  ;;  %vm280_vm7 = vcmp.eq.s32.totalorder %v955_v8, %v947_v3  ;;  %vm336_vm8 = vcmp.eq.s32.totalorder %v957_v9, %v947_v3 }
  0x2c   :  { %v1134_v47 = vadd.s32 %v576_v32, %v538_v39  ;;  %v465_v48 = vsel %vm447_vm1, 1, %v910_v11  ;;  %v298_v49 = vsel %vm280_vm7, 1, %v910_v11  ;;  %vm392_vm9 = vcmp.eq.s32.totalorder %v959_v10, %v947_v3 }
  0x2d   :  { %v427_v50 = vadd.s32 %v409_v35, %v371_v44  ;;  %v521_v51 = vsel %vm503_vm2, 1, %v910_v11  ;;  %v260_v52 = vadd.s32 %v242_v43, %v204_v46  ;;  %vm448_vm10 = vcmp.eq.s32.totalorder %v972_v15, %v947_v3 }
  0x2e   :  { %v577_v53 = vsel %vm559_vm3, 1, %v910_v11  ;;  %v354_v54 = vsel %vm336_vm8, 1, %v910_v11  ;;  %v410_v55 = vsel %vm392_vm9, 1, %v910_v11  ;;  %vm131_vm11 = vcmp.eq.s32.totalorder %v989_v24, %v947_v3 }
  0x2f   :  { %v483_v57 = vadd.s32 %v465_v48, %v427_v50  ;;  %v316_v58 = vadd.s32 %v298_v49, %v260_v52  ;;  %v466_v59 = vsel %vm448_vm10, 1, %v910_v11  ;;  %vm504_vm12 = vcmp.eq.s32.totalorder %v978_v18, %v947_v3 }
  0x30   :  { %v149_v60 = vsel %vm131_vm11, 1, %v910_v11  ;;  %vm169_vm13 = vcmp.eq.s32.totalorder %v993_v25, %v947_v3  ;;  %vm225_vm14 = vcmp.eq.s32.totalorder %v995_v26, %v947_v3  ;;  %vm281_vm15 = vcmp.eq.s32.totalorder %v997_v27, %v947_v3 }
  0x31   :  { %v539_v2 = vadd.s32 %v521_v51, %v483_v57  ;;  %v372_v61 = vadd.s32 %v354_v54, %v316_v58  ;;  %v187_v62 = vsel %vm169_vm13, 1, %v910_v11  ;;  %v243_v63 = vsel %vm225_vm14, 1, %v910_v11 }
  0x32   :  { %vm560_vm0 = vcmp.eq.s32.totalorder %v984_v21, %v947_v3  ;;  %v205_v0 = vadd.s32 %v187_v62, %v149_v60  ;;  %vm337_vm1 = vcmp.eq.s32.totalorder %v1001_v29, %v947_v3  ;;  %vm393_vm2 = vcmp.eq.s32.totalorder %v1003_v30, %v947_v3 }
  0x33   :  { %v1175_v4 = vadd.s32 %v577_v53, %v539_v2  ;;  %v428_v12 = vadd.s32 %v410_v55, %v372_v61  ;;  %v299_v13 = vsel %vm281_vm15, 1, %v910_v11  ;;  %v522_v14 = vsel %vm504_vm12, 1, %v910_v11 }
  0x34   :  { %v261_v16 = vadd.s32 %v243_v63, %v205_v0  ;;  %vm449_vm3 = vcmp.eq.s32.totalorder %v1039_v42, %v947_v3  ;;  %v578_v19 = vsel %vm560_vm0, 1, %v910_v11  ;;  %v355_v20 = vsel %vm337_vm1, 1, %v910_v11 }
  0x35   :  { %v484_v17 = vadd.s32 %v466_v59, %v428_v12  ;;  %v411_v23 = vsel %vm393_vm2, 1, %v910_v11  ;;  %vm505_vm4 = vcmp.eq.s32.totalorder %v1042_v45, %v947_v3  ;;  %vm561_vm5 = vcmp.eq.s32.totalorder %v1029_v38, %v947_v3 }
  0x36   :  { %v317_v28 = vadd.s32 %v299_v13, %v261_v16  ;;  %v1192_v31 = vadd.s32 24, %v941_v1  ;;  %v467_v33 = vsel %vm449_vm3, 1, %v910_v11  ;;  %v1196_v34 = vadd.s32 32, %v941_v1 }
  0x37   :  { %v540_v32 = vadd.s32 %v522_v14, %v484_v17  ;;  %v1199_v35 = vadd.s32 40, %v941_v1  ;;  %v523_v46 = vsel %vm505_vm4, 1, %v910_v11  ;;  %v579_v48 = vsel %vm561_vm5, 1, %v910_v11 }
  0x38   :  { %v373_v36 = vadd.s32 %v355_v20, %v317_v28  ;;  %vm132_vm6 = vcmp.eq.s32.totalorder %v949_v5, %v1192_v31  ;;  %vm170_vm7 = vcmp.eq.s32.totalorder %v951_v6, %v1192_v31  ;;  %vm226_vm8 = vcmp.eq.s32.totalorder %v953_v7, %v1192_v31 }
  0x39   :  { %v1207_v37 = vadd.s32 %v578_v19, %v540_v32  ;;  %v150_v39 = vsel %vm132_vm6, 1, %v910_v11  ;;  %v188_v40 = vsel %vm170_vm7, 1, %v910_v11  ;;  %v244_v41 = vsel %vm226_vm8, 1, %v910_v11 }
  0x3a   :  { %v429_v43 = vadd.s32 %v411_v23, %v373_v36  ;;  %v206_v44 = vadd.s32 %v188_v40, %v150_v39  ;;  %vm282_vm9 = vcmp.eq.s32.totalorder %v955_v8, %v1192_v31  ;;  %vm338_vm10 = vcmp.eq.s32.totalorder %v957_v9, %v1192_v31 }
  0x3b   :  { %v300_v49 = vsel %vm282_vm9, 1, %v910_v11  ;;  %vm394_vm11 = vcmp.eq.s32.totalorder %v959_v10, %v1192_v31  ;;  %v356_v52 = vsel %vm338_vm10, 1, %v910_v11  ;;  %v1229_v53 = vadd.s32 48, %v941_v1 }
  0x3c   :  { %v485_v50 = vadd.s32 %v467_v33, %v429_v43  ;;  %v262_v51 = vadd.s32 %v244_v41, %v206_v44  ;;  %v412_v54 = vsel %vm394_vm11, 1, %v910_v11  ;;  %vm450_vm12 = vcmp.eq.s32.totalorder %v972_v15, %v1192_v31 }
  0x3d   :  { %vm133_vm13 = vcmp.eq.s32.totalorder %v989_v24, %v1192_v31  ;;  %vm171_vm14 = vcmp.eq.s32.totalorder %v993_v25, %v1192_v31  ;;  %vm506_vm15 = vcmp.eq.s32.totalorder %v978_v18, %v1192_v31  ;;  %vm562_vm0 = vcmp.eq.s32.totalorder %v984_v21, %v1192_v31 }
  0x3e   :  { %v541_v3 = vadd.s32 %v523_v46, %v485_v50  ;;  %v318_v55 = vadd.s32 %v300_v49, %v262_v51  ;;  %v151_v57 = vsel %vm133_vm13, 1, %v910_v11  ;;  %v189_v58 = vsel %vm171_vm14, 1, %v910_v11 }
  0x3f   :  { %vm227_vm1 = vcmp.eq.s32.totalorder %v995_v26, %v1192_v31  ;;  %vm283_vm2 = vcmp.eq.s32.totalorder %v997_v27, %v1192_v31  ;;  %v207_v2 = vadd.s32 %v189_v58, %v151_v57  ;;  %v468_v62 = vsel %vm450_vm12, 1, %v910_v11 }
  0x40   :  { %v1248_v59 = vadd.s32 %v579_v48, %v541_v3  ;;  %v374_v60 = vadd.s32 %v356_v52, %v318_v55  ;;  %v245_v61 = vsel %vm227_vm1, 1, %v910_v11  ;;  %v301_v63 = vsel %vm283_vm2, 1, %v910_v11 }
  0x41   :  { %vm339_vm3 = vcmp.eq.s32.totalorder %v1001_v29, %v1192_v31  ;;  %vm395_vm4 = vcmp.eq.s32.totalorder %v1003_v30, %v1192_v31  ;;  %v524_v12 = vsel %vm506_vm15, 1, %v910_v11  ;;  %v580_v13 = vsel %vm562_vm0, 1, %v910_v11 }
  0x42   :  { %v430_v0 = vadd.s32 %v412_v54, %v374_v60  ;;  %v263_v14 = vadd.s32 %v245_v61, %v207_v2  ;;  %v357_v16 = vsel %vm339_vm3, 1, %v910_v11  ;;  %v413_v17 = vsel %vm395_vm4, 1, %v910_v11 }
  0x43   :  { %vm451_vm5 = vcmp.eq.s32.totalorder %v1039_v42, %v1192_v31  ;;  %vm134_vm6 = vcmp.eq.s32.totalorder %v949_v5, %v1196_v34  ;;  %vm507_vm7 = vcmp.eq.s32.totalorder %v1042_v45, %v1192_v31  ;;  %vm563_vm8 = vcmp.eq.s32.totalorder %v1029_v38, %v1192_v31 }
  0x44   :  { %v486_v19 = vadd.s32 %v468_v62, %v430_v0  ;;  %v319_v20 = vadd.s32 %v301_v63, %v263_v14  ;;  %v152_v23 = vsel %vm134_vm6, 1, %v910_v11  ;;  %vm172_vm9 = vcmp.eq.s32.totalorder %v951_v6, %v1196_v34 }
  0x45   :  { %vm228_vm10 = vcmp.eq.s32.totalorder %v953_v7, %v1196_v34  ;;  %vm284_vm11 = vcmp.eq.s32.totalorder %v955_v8, %v1196_v34  ;;  %v190_v33 = vsel %vm172_vm9, 1, %v910_v11  ;;  %v469_v39 = vsel %vm451_vm5, 1, %v910_v11 }
  0x46   :  { %v542_v28 = vadd.s32 %v524_v12, %v486_v19  ;;  %v375_v32 = vadd.s32 %v357_v16, %v319_v20  ;;  %v246_v36 = vsel %vm228_vm10, 1, %v910_v11  ;;  %v208_v40 = vadd.s32 %v190_v33, %v152_v23 }
  0x47   :  { %vm340_vm12 = vcmp.eq.s32.totalorder %v957_v9, %v1196_v34  ;;  %vm396_vm13 = vcmp.eq.s32.totalorder %v959_v10, %v1196_v34  ;;  %v525_v44 = vsel %vm507_vm7, 1, %v910_v11  ;;  %v302_v46 = vsel %vm284_vm11, 1, %v910_v11 }
  0x48   :  { %v1283_v41 = vadd.s32 %v580_v13, %v542_v28  ;;  %v431_v43 = vadd.s32 %v413_v17, %v375_v32  ;;  %v581_v48 = vsel %vm563_vm8, 1, %v910_v11  ;;  %v264_v49 = vadd.s32 %v246_v36, %v208_v40 }
  0x49   :  { %v358_v50 = vsel %vm340_vm12, 1, %v910_v11  ;;  %v414_v51 = vsel %vm396_vm13, 1, %v910_v11  ;;  %vm452_vm14 = vcmp.eq.s32.totalorder %v972_v15, %v1196_v34  ;;  %vm508_vm15 = vcmp.eq.s32.totalorder %v978_v18, %v1196_v34 }
  0x4a   :  { %v487_v52 = vadd.s32 %v469_v39, %v431_v43  ;;  %vm564_vm0 = vcmp.eq.s32.totalorder %v984_v21, %v1196_v34  ;;  %v320_v54 = vadd.s32 %v302_v46, %v264_v49  ;;  %vm135_vm1 = vcmp.eq.s32.totalorder %v989_v24, %v1196_v34 }
  0x4b   :  { %vm173_vm2 = vcmp.eq.s32.totalorder %v993_v25, %v1196_v34  ;;  %vm229_vm3 = vcmp.eq.s32.totalorder %v995_v26, %v1196_v34  ;;  %v153_v3 = vsel %vm135_vm1, 1, %v910_v11  ;;  %vm285_vm4 = vcmp.eq.s32.totalorder %v997_v27, %v1196_v34 }
  0x4c   :  { %v543_v31 = vadd.s32 %v525_v44, %v487_v52  ;;  %v191_v55 = vsel %vm173_vm2, 1, %v910_v11  ;;  %v247_v57 = vsel %vm229_vm3, 1, %v910_v11  ;;  %v376_v58 = vadd.s32 %v358_v50, %v320_v54 }
  0x4d   :  { %v209_v60 = vadd.s32 %v191_v55, %v153_v3  ;;  %vm341_vm5 = vcmp.eq.s32.totalorder %v1001_v29, %v1196_v34  ;;  %v470_v61 = vsel %vm452_vm14, 1, %v910_v11  ;;  %v303_v62 = vsel %vm285_vm4, 1, %v910_v11 }
  0x4e   :  { %v1315_v2 = vadd.s32 %v581_v48, %v543_v31  ;;  %vm397_vm6 = vcmp.eq.s32.totalorder %v1003_v30, %v1196_v34  ;;  %v432_v63 = vadd.s32 %v414_v51, %v376_v58  ;;  %v526_v0 = vsel %vm508_vm15, 1, %v910_v11 }
  0x4f   :  { %v582_v12 = vsel %vm564_vm0, 1, %v910_v11  ;;  %v265_v13 = vadd.s32 %v247_v57, %v209_v60  ;;  %v359_v14 = vsel %vm341_vm5, 1, %v910_v11  ;;  %v415_v16 = vsel %vm397_vm6, 1, %v910_v11 }
  0x50   :  { %vm453_vm7 = vcmp.eq.s32.totalorder %v1039_v42, %v1196_v34  ;;  %vm136_vm8 = vcmp.eq.s32.totalorder %v949_v5, %v1199_v35  ;;  %v488_v17 = vadd.s32 %v470_v61, %v432_v63  ;;  %vm509_vm9 = vcmp.eq.s32.totalorder %v1042_v45, %v1196_v34 }
  0x51   :  { %v321_v19 = vadd.s32 %v303_v62, %v265_v13  ;;  %vm565_vm10 = vcmp.eq.s32.totalorder %v1029_v38, %v1196_v34  ;;  %v154_v20 = vsel %vm136_vm8, 1, %v910_v11  ;;  %vm174_vm11 = vcmp.eq.s32.totalorder %v951_v6, %v1199_v35 }
  0x52   :  { %vm230_vm12 = vcmp.eq.s32.totalorder %v953_v7, %v1199_v35  ;;  %vm286_vm13 = vcmp.eq.s32.totalorder %v955_v8, %v1199_v35  ;;  %v544_v23 = vadd.s32 %v526_v0, %v488_v17  ;;  %v192_v32 = vsel %vm174_vm11, 1, %v910_v11 }
  0x53   :  { %v377_v28 = vadd.s32 %v359_v14, %v321_v19  ;;  %v248_v33 = vsel %vm230_vm12, 1, %v910_v11  ;;  %v471_v36 = vsel %vm453_vm7, 1, %v910_v11  ;;  %v210_v39 = vadd.s32 %v192_v32, %v154_v20 }
  0x54   :  { %vm342_vm14 = vcmp.eq.s32.totalorder %v957_v9, %v1199_v35  ;;  %vm398_vm15 = vcmp.eq.s32.totalorder %v959_v10, %v1199_v35  ;;  %v1356_v40 = vadd.s32 %v582_v12, %v544_v23  ;;  %v527_v44 = vsel %vm509_vm9, 1, %v910_v11 }
  0x55   :  { %v433_v43 = vadd.s32 %v415_v16, %v377_v28  ;;  %v304_v46 = vsel %vm286_vm13, 1, %v910_v11  ;;  %v583_v48 = vsel %vm565_vm10, 1, %v910_v11  ;;  %v266_v49 = vadd.s32 %v248_v33, %v210_v39 }
  0x56   :  { %v360_v50 = vsel %vm342_vm14, 1, %v910_v11  ;;  %v416_v51 = vsel %vm398_vm15, 1, %v910_v11  ;;  %vm454_vm0 = vcmp.eq.s32.totalorder %v972_v15, %v1199_v35  ;;  %vm510_vm1 = vcmp.eq.s32.totalorder %v978_v18, %v1199_v35 }
  0x57   :  { %v489_v52 = vadd.s32 %v471_v36, %v433_v43  ;;  %vm566_vm2 = vcmp.eq.s32.totalorder %v984_v21, %v1199_v35  ;;  %v322_v54 = vadd.s32 %v304_v46, %v266_v49  ;;  %vm137_vm3 = vcmp.eq.s32.totalorder %v989_v24, %v1199_v35 }
  0x58   :  { %vm175_vm4 = vcmp.eq.s32.totalorder %v993_v25, %v1199_v35  ;;  %vm231_vm5 = vcmp.eq.s32.totalorder %v995_v26, %v1199_v35  ;;  %v155_v31 = vsel %vm137_vm3, 1, %v910_v11  ;;  %vm287_vm6 = vcmp.eq.s32.totalorder %v997_v27, %v1199_v35 }
  0x59   :  { %v545_v34 = vadd.s32 %v527_v44, %v489_v52  ;;  %v193_v3 = vsel %vm175_vm4, 1, %v910_v11  ;;  %v249_v55 = vsel %vm231_vm5, 1, %v910_v11  ;;  %v378_v57 = vadd.s32 %v360_v50, %v322_v54 }
  0x5a   :  { %v211_v58 = vadd.s32 %v193_v3, %v155_v31  ;;  %vm343_vm7 = vcmp.eq.s32.totalorder %v1001_v29, %v1199_v35  ;;  %v472_v61 = vsel %vm454_vm0, 1, %v910_v11  ;;  %v305_v62 = vsel %vm287_vm6, 1, %v910_v11 }
  0x5b   :  { %v1388_v60 = vadd.s32 %v583_v48, %v545_v34  ;;  %vm399_vm8 = vcmp.eq.s32.totalorder %v1003_v30, %v1199_v35  ;;  %v434_v63 = vadd.s32 %v416_v51, %v378_v57  ;;  %v528_v0 = vsel %vm510_vm1, 1, %v910_v11 }
  0x5c   :  { %v584_v12 = vsel %vm566_vm2, 1, %v910_v11  ;;  %v267_v13 = vadd.s32 %v249_v55, %v211_v58  ;;  %v361_v14 = vsel %vm343_vm7, 1, %v910_v11  ;;  %v417_v16 = vsel %vm399_vm8, 1, %v910_v11 }
  0x5d   :  { %vm455_vm9 = vcmp.eq.s32.totalorder %v1039_v42, %v1199_v35  ;;  %vm138_vm10 = vcmp.eq.s32.totalorder %v949_v5, %v1229_v53  ;;  %v490_v17 = vadd.s32 %v472_v61, %v434_v63  ;;  %vm511_vm11 = vcmp.eq.s32.totalorder %v1042_v45, %v1199_v35 }
  0x5e   :  { %v323_v19 = vadd.s32 %v305_v62, %v267_v13  ;;  %vm567_vm12 = vcmp.eq.s32.totalorder %v1029_v38, %v1199_v35  ;;  %v156_v20 = vsel %vm138_vm10, 1, %v910_v11  ;;  %vm176_vm13 = vcmp.eq.s32.totalorder %v951_v6, %v1229_v53 }
  0x5f   :  { %vm232_vm14 = vcmp.eq.s32.totalorder %v953_v7, %v1229_v53  ;;  %vm288_vm15 = vcmp.eq.s32.totalorder %v955_v8, %v1229_v53  ;;  %v546_v23 = vadd.s32 %v528_v0, %v490_v17  ;;  %v194_v32 = vsel %vm176_vm13, 1, %v910_v11 }
  0x60   :  { %v379_v28 = vadd.s32 %v361_v14, %v323_v19  ;;  %v250_v33 = vsel %vm232_vm14, 1, %v910_v11  ;;  %v473_v36 = vsel %vm455_vm9, 1, %v910_v11  ;;  %v212_v39 = vadd.s32 %v194_v32, %v156_v20 }
  0x61   :  { %vm344_vm0 = vcmp.eq.s32.totalorder %v957_v9, %v1229_v53  ;;  %vm400_vm1 = vcmp.eq.s32.totalorder %v959_v10, %v1229_v53  ;;  %v1429_v43 = vadd.s32 %v584_v12, %v546_v23  ;;  %v529_v46 = vsel %vm511_vm11, 1, %v910_v11 }
  0x62   :  { %v435_v44 = vadd.s32 %v417_v16, %v379_v28  ;;  %v306_v48 = vsel %vm288_vm15, 1, %v910_v11  ;;  %v585_v49 = vsel %vm567_vm12, 1, %v910_v11  ;;  %v268_v50 = vadd.s32 %v250_v33, %v212_v39 }
  0x63   :  { %v362_v51 = vsel %vm344_vm0, 1, %v910_v11  ;;  %v418_v52 = vsel %vm400_vm1, 1, %v910_v11  ;;  %vm456_vm2 = vcmp.eq.s32.totalorder %v972_v15, %v1229_v53  ;;  %vm512_vm3 = vcmp.eq.s32.totalorder %v978_v18, %v1229_v53 }
  0x64   :  { %v491_v54 = vadd.s32 %v473_v36, %v435_v44  ;;  %vm568_vm4 = vcmp.eq.s32.totalorder %v984_v21, %v1229_v53  ;;  %v324_v34 = vadd.s32 %v306_v48, %v268_v50  ;;  %vm139_vm5 = vcmp.eq.s32.totalorder %v989_v24, %v1229_v53 }
  0x65   :  { %vm177_vm6 = vcmp.eq.s32.totalorder %v993_v25, %v1229_v53  ;;  %vm233_vm7 = vcmp.eq.s32.totalorder %v995_v26, %v1229_v53  ;;  %v157_v31 = vsel %vm139_vm5, 1, %v910_v11  ;;  %vm289_vm8 = vcmp.eq.s32.totalorder %v997_v27, %v1229_v53 }
  0x66   :  { %v547_v35 = vadd.s32 %v529_v46, %v491_v54  ;;  %v195_v3 = vsel %vm177_vm6, 1, %v910_v11  ;;  %v251_v55 = vsel %vm233_vm7, 1, %v910_v11  ;;  %v380_v57 = vadd.s32 %v362_v51, %v324_v34 }
  0x67   :  { %v213_v58 = vadd.s32 %v195_v3, %v157_v31  ;;  %vm345_vm9 = vcmp.eq.s32.totalorder %v1001_v29, %v1229_v53  ;;  %v474_v62 = vsel %vm456_vm2, 1, %v910_v11  ;;  %v307_v63 = vsel %vm289_vm8, 1, %v910_v11 }
  0x68   :  { %v1461_v61 = vadd.s32 %v585_v49, %v547_v35  ;;  %vm401_vm10 = vcmp.eq.s32.totalorder %v1003_v30, %v1229_v53  ;;  %v436_v0 = vadd.s32 %v418_v52, %v380_v57  ;;  %v530_v12 = vsel %vm512_vm3, 1, %v910_v11 }
  0x69   :  { %v586_v13 = vsel %vm568_vm4, 1, %v910_v11  ;;  %v269_v14 = vadd.s32 %v251_v55, %v213_v58  ;;  %v363_v16 = vsel %vm345_vm9, 1, %v910_v11  ;;  %v419_v17 = vsel %vm401_vm10, 1, %v910_v11 }
  0x6a   :  { %vm457_vm11 = vcmp.eq.s32.totalorder %v1039_v42, %v1229_v53  ;;  %v1483_v19 = vadd.s32 56, %v941_v1  ;;  %v492_v20 = vadd.s32 %v474_v62, %v436_v0  ;;  %vm513_vm12 = vcmp.eq.s32.totalorder %v1042_v45, %v1229_v53 }
  0x6b   :  { %v325_v23 = vadd.s32 %v307_v63, %v269_v14  ;;  %vm569_vm13 = vcmp.eq.s32.totalorder %v1029_v38, %v1229_v53  ;;  %v475_v39 = vsel %vm457_vm11, 1, %v910_v11  ;;  %v531_v51 = vsel %vm513_vm12, 1, %v910_v11 }
  0x6c   :  { %vm140_vm14 = vcmp.eq.s32.totalorder %v949_v5, %v1483_v19  ;;  %vm178_vm15 = vcmp.eq.s32.totalorder %v951_v6, %v1483_v19  ;;  %vm234_vm0 = vcmp.eq.s32.totalorder %v953_v7, %v1483_v19  ;;  %vm290_vm1 = vcmp.eq.s32.totalorder %v955_v8, %v1483_v19 }
  0x6d   :  { %v548_v28 = vadd.s32 %v530_v12, %v492_v20  ;;  %v381_v32 = vadd.s32 %v363_v16, %v325_v23  ;;  %v158_v33 = vsel %vm140_vm14, 1, %v910_v11  ;;  %v196_v36 = vsel %vm178_vm15, 1, %v910_v11 }
  0x6e   :  { %v214_v44 = vadd.s32 %v196_v36, %v158_v33  ;;  %v252_v46 = vsel %vm234_vm0, 1, %v910_v11  ;;  %vm346_vm2 = vcmp.eq.s32.totalorder %v957_v9, %v1483_v19  ;;  %v308_v50 = vsel %vm290_vm1, 1, %v910_v11 }
  0x6f   :  { %v1503_v48 = vadd.s32 %v586_v13, %v548_v28  ;;  %v437_v49 = vadd.s32 %v419_v17, %v381_v32  ;;  %vm402_vm3 = vcmp.eq.s32.totalorder %v959_v10, %v1483_v19  ;;  %v587_v52 = vsel %vm569_vm13, 1, %v910_v11 }
  0x70   :  { %v270_v54 = vadd.s32 %v252_v46, %v214_v44  ;;  %v364_v35 = vsel %vm346_vm2, 1, %v910_v11  ;;  %v420_v31 = vsel %vm402_vm3, 1, %v910_v11  ;;  %vm458_vm4 = vcmp.eq.s32.totalorder %v972_v15, %v1483_v19 }
  0x71   :  { %v493_v34 = vadd.s32 %v475_v39, %v437_v49  ;;  %vm514_vm5 = vcmp.eq.s32.totalorder %v978_v18, %v1483_v19  ;;  %vm141_vm6 = vcmp.eq.s32.totalorder %v989_v24, %v1483_v19  ;;  %vm179_vm7 = vcmp.eq.s32.totalorder %v993_v25, %v1483_v19 }
  0x72   :  { %v326_v3 = vadd.s32 %v308_v50, %v270_v54  ;;  %v159_v55 = vsel %vm141_vm6, 1, %v910_v11  ;;  %v197_v57 = vsel %vm179_vm7, 1, %v910_v11  ;;  %vm235_vm8 = vcmp.eq.s32.totalorder %v995_v26, %v1483_v19 }
  0x73   :  { %v549_v53 = vadd.s32 %v531_v51, %v493_v34  ;;  %v215_v62 = vadd.s32 %v197_v57, %v159_v55  ;;  %v253_v63 = vsel %vm235_vm8, 1, %v910_v11  ;;  %vm291_vm9 = vcmp.eq.s32.totalorder %v997_v27, %v1483_v19 }
  0x74   :  { %v382_v58 = vadd.s32 %v364_v35, %v326_v3  ;;  %v476_v12 = vsel %vm458_vm4, 1, %v910_v11  ;;  %v309_v13 = vsel %vm291_vm9, 1, %v910_v11  ;;  %vm347_vm10 = vcmp.eq.s32.totalorder %v1001_v29, %v1483_v19 }
  0x75   :  { %v1533_v0 = vadd.s32 %v587_v52, %v549_v53  ;;  %vm570_vm11 = vcmp.eq.s32.totalorder %v984_v21, %v1483_v19  ;;  %v271_v16 = vadd.s32 %v253_v63, %v215_v62  ;;  %vm403_vm12 = vcmp.eq.s32.totalorder %v1003_v30, %v1483_v19 }
  0x76   :  { %v438_v14 = vadd.s32 %v420_v31, %v382_v58  ;;  %v532_v17 = vsel %vm514_vm5, 1, %v910_v11  ;;  %v365_v20 = vsel %vm347_vm10, 1, %v910_v11  ;;  %v83_v23 = vadd.s32 64, %v941_v1 }
  0x77   :  { %v327_v32 = vadd.s32 %v309_v13, %v271_v16  ;;  %vm459_vm13 = vcmp.eq.s32.totalorder %v1039_v42, %v1483_v19  ;;  %v588_v33 = vsel %vm570_vm11, 1, %v910_v11  ;;  %v421_v36 = vsel %vm403_vm12, 1, %v910_v11 }
  0x78   :  { %v494_v28 = vadd.s32 %v476_v12, %v438_v14  ;;  %100 = vst [vmem:[#allocation3 + $0x68] sm:$0xf] %v83_v23  ;;  %vm515_vm14 = vcmp.eq.s32.totalorder %v1042_v45, %v1483_v19  ;;  %v477_v46 = vsel %vm459_vm13, 1, %v910_v11  ;;  %vm571_vm15 = vcmp.eq.s32.totalorder %v1029_v38, %v1483_v19 }
  0x79   :  { %v383_v44 = vadd.s32 %v365_v20, %v327_v32  ;;  %101 = vst [vmem:[#allocation3 + $0x60] sm:$0xf] %v83_v23  ;;  %v533_v50 = vsel %vm515_vm14, 1, %v910_v11  ;;  %v589_v52 = vsel %vm571_vm15, 1, %v910_v11 }
  0x7a   :  { %v550_v39 = vadd.s32 %v532_v17, %v494_v28 }
  0x7b   :  { %v439_v1 = vadd.s32 %v421_v36, %v383_v44 }
  0x7c   :  { %v1556_v49 = vadd.s32 %v588_v33, %v550_v39 }
  0x7d   :  { %v495_v51 = vadd.s32 %v477_v46, %v439_v1 }
  0x7f   :  { %v551_v54 = vadd.s32 %v533_v50, %v495_v51  ;;  %v122_v34 = vld [vmem:[#allocation3 + $0x68] sm:$0xf] }
  0x80   :  { %vm142_vm0 = vcmp.eq.s32.totalorder %v949_v5, %v122_v34  ;;  %vm180_vm1 = vcmp.eq.s32.totalorder %v951_v6, %v122_v34  ;;  %vm236_vm2 = vcmp.eq.s32.totalorder %v953_v7, %v122_v34  ;;  %vm292_vm3 = vcmp.eq.s32.totalorder %v955_v8, %v122_v34  ;;  %v123_v53 = vld [vmem:[#allocation3 + $0x60] sm:$0xf] }
  0x81   :  { %v1565_v35 = vadd.s32 %v589_v52, %v551_v54  ;;  %v160_v31 = vsel %vm142_vm0, 1, %v910_v11  ;;  %v198_v3 = vsel %vm180_vm1, 1, %v910_v11  ;;  %v254_v55 = vsel %vm236_vm2, 1, %v910_v11 }
  0x82   :  { %v216_v19 = vadd.s32 %v198_v3, %v160_v31  ;;  %vm348_vm4 = vcmp.eq.s32.totalorder %v957_v9, %v122_v34  ;;  %v310_v5 = vsel %vm292_vm3, 1, %v910_v11  ;;  %vm143_vm5 = vcmp.eq.s32.totalorder %v989_v24, %v123_v53 }
  0x83   :  { %vm181_vm6 = vcmp.eq.s32.totalorder %v993_v25, %v123_v53  ;;  %vm237_vm7 = vcmp.eq.s32.totalorder %v995_v26, %v123_v53  ;;  %vm404_vm8 = vcmp.eq.s32.totalorder %v959_v10, %v122_v34  ;;  %v161_v7 = vsel %vm143_vm5, 1, %v910_v11 }
  0x84   :  { %v272_v57 = vadd.s32 %v254_v55, %v216_v19  ;;  %v199_v8 = vsel %vm181_vm6, 1, %v910_v11  ;;  %v366_v58 = vsel %vm348_vm4, 1, %v910_v11  ;;  %vm293_vm9 = vcmp.eq.s32.totalorder %v997_v27, %v123_v53 }
  0x85   :  { %v217_v62 = vadd.s32 %v199_v8, %v161_v7  ;;  %vm460_vm10 = vcmp.eq.s32.totalorder %v972_v15, %v122_v34  ;;  %v255_v24 = vsel %vm237_vm7, 1, %v910_v11  ;;  %v422_v25 = vsel %vm404_vm8, 1, %v910_v11 }
  0x86   :  { %v328_v6 = vadd.s32 %v310_v5, %v272_v57  ;;  %vm349_vm11 = vcmp.eq.s32.totalorder %v1001_v29, %v123_v53  ;;  %vm516_vm12 = vcmp.eq.s32.totalorder %v978_v18, %v122_v34  ;;  %v311_v63 = vsel %vm293_vm9, 1, %v910_v11 }
  0x87   :  { %v273_v26 = vadd.s32 %v255_v24, %v217_v62  ;;  %v478_v12 = vsel %vm460_vm10, 1, %v910_v11  ;;  %vm405_vm13 = vcmp.eq.s32.totalorder %v1003_v30, %v123_v53  ;;  %vm572_vm14 = vcmp.eq.s32.totalorder %v984_v21, %v122_v34 }
  0x88   :  { %v384_v9 = vadd.s32 %v366_v58, %v328_v6  ;;  %v367_v15 = vsel %vm349_vm11, 1, %v910_v11  ;;  %v534_v14 = vsel %vm516_vm12, 1, %v910_v11  ;;  %vm461_vm15 = vcmp.eq.s32.totalorder %v1039_v42, %v123_v53 }
  0x89   :  { %v329_v13 = vadd.s32 %v311_v63, %v273_v26  ;;  %v423_v18 = vsel %vm405_vm13, 1, %v910_v11  ;;  %v590_v17 = vsel %vm572_vm14, 1, %v910_v11  ;;  %vm517_vm0 = vcmp.eq.s32.totalorder %v1042_v45, %v123_v53 }
  0x8a   :  { %v440_v10 = vadd.s32 %v422_v25, %v384_v9  ;;  %v479_v30 = vsel %vm461_vm15, 1, %v910_v11  ;;  %vm573_vm1 = vcmp.eq.s32.totalorder %v1029_v38, %v123_v53  ;;  %v535_v21 = vsel %vm517_vm0, 1, %v910_v11 }
  0x8b   :  { %v385_v16 = vadd.s32 %v367_v15, %v329_v13  ;;  %v591_v33 = vsel %vm573_vm1, 1, %v910_v11 }
  0x8c   :  { %v496_v27 = vadd.s32 %v478_v12, %v440_v10 }
  0x8d   :  { %v441_v20 = vadd.s32 %v423_v18, %v385_v16 }
  0x8e   :  { %v552_v29 = vadd.s32 %v534_v14, %v496_v27 }
  0x8f   :  { %v497_v28 = vadd.s32 %v479_v30, %v441_v20 }
  0x90   :  { %v608_v23 = vadd.s32 %v590_v17, %v552_v29 }
  0x91   :  { %v553_v32 = vadd.s32 %v535_v21, %v497_v28 }
  0x92   :  { %v637_v36 = vcvt.s32.f32 %v608_v23 }
  0x93   :  { %v609_v42 = vadd.s32 %v591_v33, %v553_v32 }
  0x95   :  { %v638_v39 = vcvt.s32.f32 %v609_v42 }
  0x96   :  { %902 = dma.done.wait [#allocation4], 256 }
  0x97   :  { %903 = vsyncadd [#allocation4], 4294967040  ;;  %vm666_vm2 = vcmask 1041408   ;;  %v633_v44 = vcvt.s32.f32 %v1503_v48  ;;  %v635_v45 = vcvt.s32.f32 %v1556_v49  ;;  %v647_v46 = vpack.c.bf16 %v637_v36, %v637_v36  ;;  %v778_v5 = vld [vmem:[#allocation2 + $0x8] sm:$0xff]  ;;  %s912_s2 = smov [#allocation10]   ;;  %s744_s30 = sshll.u32 %s1622_s3, 4  ;;  %s745_s30 = int_to_ptr.hbm [resolvable:$true] %s744_s30 }
  0x98   :  { %v648_v1 = vpack.c.bf16 %v638_v39, %v638_v39  ;;  %v634_v50 = vcvt.s32.f32 %v1533_v0  ;;  %v636_v38 = vcvt.s32.f32 %v1565_v35  ;;  %v629_v54 = vcvt.s32.f32 %v1356_v40  ;;  %s742_s27 = sshll.u32 %s912_s2, 4  ;;  %s913_s4 = smov 128   ;;  %s743_s27 = int_to_ptr.vmem [resolvable:$true] %s742_s27 }
  0x99   :  { %v668_v51 = vsel %vm666_vm2, %v647_v46, 0  ;;  %v645_v11 = vpack.c.bf16 %v635_v45, %v633_v44  ;;  %v631_v34 = vcvt.s32.f32 %v1429_v43  ;;  %v630_v49 = vcvt.s32.f32 %v1388_v60  ;;  %s914_s5 = smov 8  }
  0x9a   :  { %v671_v52 = vsel %vm666_vm2, %v648_v1, 0  ;;  %676 = vmatpush.bf16.msra.mxu0 %v668_v51  ;;  %779 = vmatpush.bf16.msra.mxu2 %v668_v51  ;;  %v646_v48 = vpack.c.bf16 %v636_v38, %v634_v50  ;;  %v632_v31 = vcvt.s32.f32 %v1461_v61  ;;  %v625_v35 = vcvt.s32.f32 %v1207_v37 }
  0x9b   :  { %695 = vmatpush.bf16.msra.mxu1 %v671_v52  ;;  %784 = vmatpush.bf16.msra.mxu3 %v671_v52  ;;  %v643_v0 = vpack.c.bf16 %v631_v34, %v629_v54  ;;  %v627_v3 = vcvt.s32.f32 %v1283_v41  ;;  %v626_v40 = vcvt.s32.f32 %v1248_v59  ;;  %v628_v43 = vcvt.s32.f32 %v1315_v2  ;;  %v777_v2 = vld [vmem:[#allocation2] sm:$0xff] }
  0x9c   :  { %v644_v19 = vpack.c.bf16 %v632_v31, %v630_v49  ;;  %v621_v60 = vcvt.s32.f32 %v1063_v56  ;;  %v623_v61 = vcvt.s32.f32 %v1134_v47  ;;  %v622_v37 = vcvt.s32.f32 %v1102_v22  ;;  %v711_v56 = vld [vmem:[#allocation8] sm:$0x3] }
  0x9d   :  { %v641_v53 = vpack.c.bf16 %v627_v3, %v625_v35  ;;  %v642_v55 = vpack.c.bf16 %v628_v43, %v626_v40  ;;  %v624_v41 = vcvt.s32.f32 %v1175_v4  ;;  %vm659_vm3 = vcmask 556032  }
  0x9e   :  { %677 = vmatpush.bf16.msra.mxu0 %v645_v11  ;;  %780 = vmatpush.bf16.msra.mxu2 %v645_v11  ;;  %v639_v57 = vpack.c.bf16 %v623_v61, %v621_v60  ;;  %800 = vrcp.f32 %v711_v56 }
  0x9f   :  { %696 = vmatpush.bf16.msra.mxu1 %v646_v48  ;;  %785 = vmatpush.bf16.msra.mxu3 %v646_v48  ;;  %v640_v59 = vpack.c.bf16 %v624_v41, %v622_v37 }
  0xa2   :  { %678 = vmatpush.bf16.msra.mxu0 %v643_v0  ;;  %781 = vmatpush.bf16.msra.mxu2 %v643_v0 }
  0xa3   :  { %697 = vmatpush.bf16.msra.mxu1 %v644_v19  ;;  %786 = vmatpush.bf16.msra.mxu3 %v644_v19 }
  0xa4   :  { %v801_v22 = vpop.eup %800 }
  0xa5   :  { %v714_v47 = vperm.slane %v801_v22, 0  ;;  %v715_v4 = vperm.slane %v801_v22, 1 }
  0xa6   :  { %679 = vmatpush.bf16.msra.mxu0 %v641_v53  ;;  %782 = vmatpush.bf16.msra.mxu2 %v641_v53 }
  0xa7   :  { %698 = vmatpush.bf16.msra.mxu1 %v642_v55  ;;  %787 = vmatpush.bf16.msra.mxu3 %v642_v55 }
  0xaa   :  { %680 = vmatpush.bf16.msra.mxu0 %v639_v57  ;;  %783 = vmatpush.bf16.msra.mxu2 %v639_v57 }
  0xab   :  { %699 = vmatpush.bf16.msra.mxu1 %v640_v59  ;;  %788 = vmatpush.bf16.msra.mxu3 %v640_v59 }
  0xad   :  { %772 = vmatmul.msk.bf16.vlgmr.msra.gmra.mxu0 %vm659_vm3, %v777_v2  ;;  %773 = vmatmul.msk.bf16.vlgmr.msra.gmra.mxu2 %vm659_vm3, %v778_v5 }
  0xae   :  { %774 = vmatmul.msk.bf16.vlgmr.msra.gmra.mxu1 %vm659_vm3, %v777_v2  ;;  %775 = vmatmul.msk.bf16.vlgmr.msra.gmra.mxu3 %vm659_vm3, %v778_v5 }
 0x12a   :  { %v682_v6 = vpop.f32.mrf.mxu0 }
 0x12b   :  { %v718_v7 = vmul.f32 %v714_v47, %v682_v6  ;;  %v701_v8 = vpop.f32.mrf.mxu1 }
 0x12c   :  { %v719_v58 = vmul.f32 %v715_v4, %v701_v8 }
 0x12e   :  { %v726_v62 = vpack.c.bf16 %v719_v58, %v718_v7 }
 0x130   :  { %730 = vst [vmem:[#allocation10] sm:$0xff] %v726_v62  ;;  %v687_v9 = vpop.f32.mrf.mxu2 }
 0x131   :  { %v722_v24 = vmul.f32 %v714_v47, %v687_v9  ;;  %v706_v25 = vpop.f32.mrf.mxu3 }
 0x132   :  { %v723_v26 = vmul.f32 %v715_v4, %v706_v25  ;;  %v684_v10 = vpop.f32.mrf.mxu0 }
 0x133   :  { %v720_v63 = vmul.f32 %v714_v47, %v684_v10  ;;  %v703_v12 = vpop.f32.mrf.mxu1 }
 0x134   :  { %v728_v13 = vpack.c.bf16 %v723_v26, %v722_v24  ;;  %v721_v27 = vmul.f32 %v715_v4, %v703_v12 }
 0x136   :  { %732 = vst [vmem:[#allocation10 + $0x10] sm:$0xff] %v728_v13  ;;  %v727_v15 = vpack.c.bf16 %v721_v27, %v720_v63 }
 0x138   :  { %731 = vst [vmem:[#allocation10 + $0x8] sm:$0xff] %v727_v15  ;;  %v689_v14 = vpop.f32.mrf.mxu2 }
 0x139   :  { %v724_v16 = vmul.f32 %v714_v47, %v689_v14  ;;  %v708_v29 = vpop.f32.mrf.mxu3 }
 0x13a   :  { %v725_v18 = vmul.f32 %v715_v4, %v708_v29 }
 0x13c   :  { %v729_v17 = vpack.c.bf16 %v725_v18, %v724_v16 }
 0x13e   :  { %733 = vst [vmem:[#allocation10 + $0x18] sm:$0xff] %v729_v17 }
 0x13f   :  { %750 = dma.vmem_to_hbm [thread:$0]  %s743_s27, 512, %s745_s30, [#allocation7], %s913_s4, %s913_s4, %s914_s5  }
 0x140   :  { %904 = dma.done.wait [#allocation7], 512  }
 0x141   :  { %905 = vsyncadd [#allocation7], 4294966784 }
 0x142   :  { %755 = vsyncpa [#allocation6], 1 }
 0x143   :  { %756 = vsyncpa [#allocation9], 1 }
 0x144   :  { %757 = vsyncpa [#allocation7], 1 }
 0x145   :  { %758 = vsyncmov [#allocation4] }
 0x148   :  { %s759_s6 = vpop.sfrf %758 }
 0x149   :  { %p776_p0 = scmp.ne.s32.totalorder %s759_s6, 0 }
 0x14b   :  { %763 = shalt.err (%p776_p0)  }

</bundles_post_ra>
